<compile_context>
chip_gen: v5e
topology: v5e:2x2
jax: 0.10.0
libtpu: 0.0.40
codegen_flags: <defaults>
</compile_context>

<pallas_src>
import jax
import jax.numpy as jnp
import numpy as np
from jax.experimental import pallas as pl
from jax.experimental.pallas import tpu as pltpu


# --------------------------- Pallas kernel ----------------------------------
def _gate_kernel(x_ref, o_ref):
    # x_ref: (1, 2, *S)  -- x_ref[0, 0] = tanh-chunk, x_ref[0, 1] = sigmoid-chunk
    # o_ref: (1, *S)
    t0 = x_ref[0, 0].astype(jnp.float32)
    t1 = x_ref[0, 1].astype(jnp.float32)
    y = jnp.tanh(t0) * jax.nn.sigmoid(t1 - 2.0)          # VPU + EUP only
    o_ref[0] = y.astype(o_ref.dtype)


def _row_tile(rows, max_rows=512):
    """Largest sublane-aligned row tile (<= max_rows) that divides `rows`."""
    if rows <= max_rows:
        return rows
    for t in range(max_rows, 0, -8):                      # multiples of 8
        if rows % t == 0:
            return t
    return rows                                           # fallback: full slab


# --------------------------- wrapper -----------------------------------------
def gate_forward(x):
    """Pallas implementation of Gate.forward (num_gates=2).  x: (N, C, H, W)."""
    N, C, H, W = x.shape
    assert C % 2 == 0, "Gate with num_gates=2 needs an even channel count"
    Ch = C // 2
    M = Ch * H * W

    # torch.chunk(x, 2, dim=1) on contiguous NCHW == leading/trailing halves of
    # the flattened per-sample data -> pure (zero-copy) reshape, no HBM copy.
    if M % 128 == 0:
        # Lane-dense path: (rows, 128) tiles, unmasked stores.
        R = M // 128
        TR = _row_tile(R)
        xr = x.reshape(N, 2, R, 128)
        out = pl.pallas_call(
            _gate_kernel,
            out_shape=jax.ShapeDtypeStruct((N, R, 128), x.dtype),
            grid=(N, R // TR),
            in_specs=[pl.BlockSpec((1, 2, TR, 128), lambda n, r: (n, 0, r, 0))],
            out_specs=pl.BlockSpec((1, TR, 128), lambda n, r: (n, r, 0)),
            compiler_params=pltpu.CompilerParams(
                dimension_semantics=("parallel", "parallel")),
        )(xr)
    else:
        # Generic fallback: full per-sample slab (last block dims == full dims).
        xr = x.reshape(N, 2, 1, M)
        out = pl.pallas_call(
            _gate_kernel,
            out_shape=jax.ShapeDtypeStruct((N, 1, M), x.dtype),
            grid=(N,),
            in_specs=[pl.BlockSpec((1, 2, 1, M), lambda n: (n, 0, 0, 0))],
            out_specs=pl.BlockSpec((1, 1, M), lambda n: (n, 0, 0)),
            compiler_params=pltpu.CompilerParams(
                dimension_semantics=("parallel",)),
        )(xr)

    return out.reshape(N, Ch, H, W)


# --------------------------- pure-JAX reference -------------------------------
def reference_forward(x):
    t0, t1 = jnp.split(x, 2, axis=1)
    return jax.nn.sigmoid(t1 - 2.0) * jnp.tanh(t0)


# --------------------------- main ---------------------------------------------
if __name__ == "__main__":
    N, C, H, W = 2, 4, 16, 16
    key = jax.random.PRNGKey(0)
    x = jax.random.normal(key, (N, C, H, W), jnp.float32)

    out = jax.jit(gate_forward)(x)
    out = jax.block_until_ready(out)
    assert out.shape == (N, C // 2, H, W), out.shape

    ref = reference_forward(x)
    np.testing.assert_allclose(np.asarray(out), np.asarray(ref),
                               atol=1e-4, rtol=1e-4)

    print("KERNEL_OK")
</pallas_src>

<mosaic_0001>
module attributes {stable_mosaic.version = 11 : i64} {
  func.func @_gate_kernel(%arg0: i32, %arg1: i32, %arg2: memref<1x2x4x128xf32, #tpu.memory_space<vmem>>, %arg3: memref<1x4x128xf32, #tpu.memory_space<vmem>>) attributes {dimension_semantics = [#tpu.dimension_semantics<parallel>, #tpu.dimension_semantics<parallel>], iteration_bounds = array<i64: 2, 1>, scalar_prefetch = 0 : i64, scratch_operands = 0 : i64, tpu.core_type = #tpu.core_type<tc>, window_params = [{transform_indices = @transform_0, window_bounds = array<i64: 1, 2, 4, 128>}, {transform_indices = @transform_1, window_bounds = array<i64: 1, 4, 128>}]} {
    %c0 = arith.constant 0 : index
    %c0_0 = arith.constant 0 : index
    %c0_1 = arith.constant 0 : index
    %c0_2 = arith.constant 0 : index
    %0 = vector.load %arg2[%c0, %c0_0, %c0_1, %c0_2] : memref<1x2x4x128xf32, #tpu.memory_space<vmem>>, vector<1x1x4x128xf32>
    %1 = vector.shape_cast %0 : vector<1x1x4x128xf32> to vector<4x128xf32>
    %c0_3 = arith.constant 0 : index
    %c1 = arith.constant 1 : index
    %c0_4 = arith.constant 0 : index
    %c0_5 = arith.constant 0 : index
    %2 = vector.load %arg2[%c0_3, %c1, %c0_4, %c0_5] : memref<1x2x4x128xf32, #tpu.memory_space<vmem>>, vector<1x1x4x128xf32>
    %3 = vector.shape_cast %2 : vector<1x1x4x128xf32> to vector<4x128xf32>
    %4 = math.tanh %1 : vector<4x128xf32>
    %cst = arith.constant 2.000000e+00 : f32
    %5 = vector.broadcast %cst : f32 to vector<4x128xf32>
    %6 = arith.subf %3, %5 : vector<4x128xf32>
    %7 = arith.negf %6 : vector<4x128xf32>
    %8 = math.exp %7 : vector<4x128xf32>
    %cst_6 = arith.constant 1.000000e+00 : f32
    %9 = vector.broadcast %cst_6 : f32 to vector<4x128xf32>
    %10 = arith.addf %9, %8 : vector<4x128xf32>
    %11 = arith.divf %9, %10 : vector<4x128xf32>
    %12 = arith.mulf %4, %11 : vector<4x128xf32>
    %c0_7 = arith.constant 0 : index
    %c0_8 = arith.constant 0 : index
    %c0_9 = arith.constant 0 : index
    %13 = vector.load %arg3[%c0_7, %c0_8, %c0_9] : memref<1x4x128xf32, #tpu.memory_space<vmem>>, vector<1x4x128xf32>
    %14 = vector.shape_cast %13 : vector<1x4x128xf32> to vector<4x128xf32>
    %15 = vector.shape_cast %12 : vector<4x128xf32> to vector<1x4x128xf32>
    tpu.vector_store %arg3[%c0_7, %c0_8, %c0_9], %15 {strides = array<i32>} : memref<1x4x128xf32, #tpu.memory_space<vmem>>, vector<1x4x128xf32>,
    return
  }
  func.func @transform_0(%arg0: i32, %arg1: i32) -> (i32, i32, i32, i32) {
    %c0_i32 = arith.constant 0 : i32
    %c0_i32_0 = arith.constant 0 : i32
    %c0_i32_1 = arith.constant 0 : i32
    return %arg0, %c0_i32, %arg1, %c0_i32_0 : i32, i32, i32, i32
  }
  func.func @transform_1(%arg0: i32, %arg1: i32) -> (i32, i32, i32) {
    %c0_i32 = arith.constant 0 : i32
    %c0_i32_0 = arith.constant 0 : i32
    return %arg0, %arg1, %c0_i32 : i32, i32, i32
  }
}

</mosaic_0001>

<bundles_post_ra>
// kernel: gate_forward.1
= control target key start
LH: loop header
LB: loop body
LE: loop exit
PB: predicated region body
PF: predicated region fallthrough
CT: control target
= control target key end

     0   :  { %s327_s6 = smov 0   ;;  %s329_s7 = smov 0   ;;  %s360_s0 = inlined_call_operand.vmem [shape: f32[2,2,4,128], index: 0, kind: input, shape index: {}]   ;;  %s361_s1 = inlined_call_operand.vmem [shape: f32[2,4,128], index: 1, kind: output, shape index: {}]  }
   0x1   :  { %s331_s8 = smov 0  }
   0x2 LB: > { %s23_s9 = sadd.s32 1, %s311_s7  ;;  %p253_p0 = scmp.ge.s32.totalorder %s315_s8, 1  ;;  %s315_s8 = sphi %s331_s8, %s11_s8   ;;  %s311_s7 = sphi %s329_s7, %s363_s7   ;;  %s307_s6 = sphi %s327_s6, %s362_s6  }
   0x3   : > { %p25_p1 = scmp.ge.s32.totalorder %s23_s9, 2  ;;  %p106_p2 = scmp.lt.s32.totalorder %s315_s8, 3 }
   0x5   : > { %s365_s9 = smov (%p25_p1, %s23_s9), 0  ;;  %p107_p3 = pnand %p253_p0, %p106_p2 }
   0x6   : > { %p131_p4 = scmp.lt.s32.totalorder (!%p107_p3), %s307_s6, 1 }
   0x7   : > { %110 = sbr.rel (%p107_p3) target bundleno = 49 (0x31), region = 24 }
   0xc   : > { %s367_s6 = smov (!%p131_p4, %s307_s6), 1 }
   0xd   : > { %s262_s10 = sshll.u32 %s367_s6, 3  ;;  %s256_s14 = sshll.u32 %s367_s6, 2 }
   0xe   : > { %s138_s13 = scalar_lea.vmem %s360_s0, %s262_s10  ;;  %s145_s17 = scalar_lea.vmem %s361_s1, %s256_s14 }
   0xf   : > { %v257_v0 = vld [vmem:[%s138_s13 + $0x4] sm:$0xf]  ;;  %v146_v5 = vld [vmem:[%s138_s13] sm:$0xf] }
  0x10   : > { %v258_v1 = vadd.f32 -2.0, %v257_v0 }
  0x12   : > { %v259_v2 = vmul.f32 -1.442695, %v258_v1 }
  0x14   : > { %287 = vpow2.f32 %v259_v2 }
  0x1a   : > { %v288_v3 = vpop.eup %287 }
  0x1b   : > { %v154_v4 = vadd.f32 1.0, %v288_v3 }
  0x1d   : > { %289 = vrcp.f32 %v154_v4  ;;  %v166_v8 = vand.u32 2147483648, %v154_v4  ;;  %vm160_vm0 = vweird.f32 %v154_v4  ;;  %v164_v10 = vand.u32 2147483647, %v154_v4 }
  0x1e   : > { %291 = vtanh.f32 %v146_v5 }
  0x1f   : > { %v167_v12 = vor.u32 1.1754944e-38, %v166_v8  ;;  %vm165_vm3 = vcmp.eq.f32.partialorder %v164_v10, 8.507059e+37 }
  0x23   : > { %v290_v6 = vpop.eup %289 }
  0x24   : > { %v156_v7 = vmul.f32 %v290_v6, %v154_v4  ;;  %vm161_vm1 = vweird.f32 %v290_v6  ;;  %v292_v14 = vpop.eup %291 }
  0x25   : > { %vm162_vm2 = vmor %vm160_vm0, %vm161_vm1 }
  0x26   : > { %v157_v9 = vsub.f32 1.0, %v156_v7 }
  0x28   : > { %v158_v11 = vmul.f32 %v290_v6, %v157_v9 }
  0x2a   : > { %v159_v13 = vadd.f32 %v290_v6, %v158_v11 }
  0x2c   : > { %v163_v15 = vsel %vm162_vm2, %v290_v6, %v159_v13 }
  0x2d   : > { %v168_v16 = vsel %vm165_vm3, %v167_v12, %v163_v15 }
  0x2e   : > { %v170_v17 = vmul.f32 %v292_v14, %v168_v16 }
  0x30   : > { %171 = vst [vmem:[%s145_s17] sm:$0xf] %v170_v17 }
  0x31 PF: > { %s11_s8 = sadd.s32 1, %s315_s8   ;;  %s362_s6 = smov %s311_s7 }
  0x32   : > { %p8_p5 = scmp.ge.s32.totalorder %s11_s8, 4   ;;  %s363_s7 = smov %s365_s9 }
  0x34   :  { %10 = sbr.rel (!%p8_p5) target bundleno = 2 (0x2), region = 55 }

</bundles_post_ra>
